<compile_context>
chip_gen: v7x
topology: tpu7x:2x2x1
jax: 0.10.0
libtpu: 0.0.40
codegen_flags: <defaults>
</compile_context>

<pallas_src>
import jax
import jax.numpy as jnp
from jax.experimental import pallas as pl
from jax.experimental.pallas import tpu as pltpu


LANE = 128


def _round_up(x, m):
    return ((x + m - 1) // m) * m


def _encoder_gru_seq_kernel(toks_ref,     # scalar-prefetch: (T,) int32 in SMEM
                            emb_row_ref,  # (1, 1, Hp) bf16  gathered embedding row
                            h0_ref,       # (1, Hp)   f32    initial hidden
                            w_ref,        # (2Hp, 4Hp) bf16  fused [x|h] -> [r|z|ni|nh]
                            b_ref,        # (1, 4Hp)  f32    fused bias
                            out_ref,      # (1, 1, Hp) f32   GRU output for this step
                            h_scr):       # (1, Hp)   f32    persistent hidden carry
    del toks_ref  # token gather is done entirely by the embedding index_map
    Hp = h_scr.shape[-1]
    t = pl.program_id(0)

    @pl.when(t == 0)
    def _():
        h_scr[...] = h0_ref[...]

    h = h_scr[...]                                   # (1, Hp) f32
    x = emb_row_ref[0]                               # (1, Hp) bf16

    # Single fused MXU push: [x | h] (1, 2Hp) @ W_big (2Hp, 4Hp), f32 accumulate.
    xh = jnp.concatenate([x, h.astype(x.dtype)], axis=-1)      # (1, 2Hp) bf16
    g = jnp.dot(xh, w_ref[...], preferred_element_type=jnp.float32) + b_ref[...]

    r = jax.nn.sigmoid(g[:, 0:Hp])                   # reset gate
    z = jax.nn.sigmoid(g[:, Hp:2 * Hp])              # update gate
    n = jnp.tanh(g[:, 2 * Hp:3 * Hp] + r * g[:, 3 * Hp:4 * Hp])
    h_new = (1.0 - z) * n + z * h                    # (1, Hp) f32

    h_scr[...] = h_new
    out_ref[0] = h_new                               # output == new hidden (seq step)


def encoder_rnn_forward(tokens, hidden0, params):
    """Run the encoder over a whole token sequence in one pallas_call.

    tokens:  (T,) int token ids
    hidden0: (1, 1, H) float32
    returns: (outputs (T, 1, H), final_hidden (1, 1, H))
    """
    emb_pad = params["emb_pad"]          # (V, 1, Hp) bf16
    w_big = params["w_big"]              # (2Hp, 4Hp) bf16
    b_big = params["b_big"]              # (1, 4Hp)  f32
    Hp = params["hp"]
    H = params["hidden_size"]

    tokens = jnp.asarray(tokens, dtype=jnp.int32).reshape(-1)
    T = tokens.shape[0]

    h0 = jnp.zeros((1, Hp), jnp.float32)
    h0 = h0.at[:, :H].set(hidden0.reshape(1, H).astype(jnp.float32))

    grid_spec = pltpu.PrefetchScalarGridSpec(
        num_scalar_prefetch=1,
        grid=(T,),
        in_specs=[
            # data-dependent embedding row gather via scalar prefetch
            pl.BlockSpec((1, 1, Hp), lambda t, toks: (toks[t], 0, 0)),
            # initial hidden, fused weights and bias: constant index_map =>
            # DMA'd once, resident in VMEM across all grid steps
            pl.BlockSpec((1, Hp), lambda t, toks: (0, 0)),
            pl.BlockSpec((2 * Hp, 4 * Hp), lambda t, toks: (0, 0)),
            pl.BlockSpec((1, 4 * Hp), lambda t, toks: (0, 0)),
        ],
        out_specs=pl.BlockSpec((1, 1, Hp), lambda t, toks: (t, 0, 0)),
        scratch_shapes=[pltpu.VMEM((1, Hp), jnp.float32)],
    )

    outs = pl.pallas_call(
        _encoder_gru_seq_kernel,
        out_shape=jax.ShapeDtypeStruct((T, 1, Hp), jnp.float32),
        grid_spec=grid_spec,
        compiler_params=pltpu.CompilerParams(
            # time axis is a true recurrence -> sequential
            dimension_semantics=("arbitrary",)),
    )(tokens, emb_pad, h0, w_big, b_big)

    outputs = outs[:, :, :H]                         # (T, 1, H), drop lane padding
    final_hidden = outputs[-1].reshape(1, 1, H)
    return outputs, final_hidden


def encoder_rnn_step(token_id, hidden, params):
    """Exact equivalent of EncoderRNN.forward(input, hidden) for one token."""
    tokens = jnp.asarray(token_id, dtype=jnp.int32).reshape(1)
    outputs, final_hidden = encoder_rnn_forward(tokens, hidden, params)
    return outputs.reshape(1, 1, -1), final_hidden


def init_params(input_size, hidden_size, key):
    """Raw parameters in torch layout (nn.Embedding + nn.GRU shapes)."""
    k_emb, k_wih, k_whh, k_bih, k_bhh = jax.random.split(key, 5)
    bound = 1.0 / float(hidden_size) ** 0.5
    return {
        "embedding": jax.random.normal(k_emb, (input_size, hidden_size), jnp.float32),
        "w_ih": jax.random.uniform(k_wih, (3 * hidden_size, hidden_size),
                                   jnp.float32, -bound, bound),
        "w_hh": jax.random.uniform(k_whh, (3 * hidden_size, hidden_size),
                                   jnp.float32, -bound, bound),
        "b_ih": jax.random.uniform(k_bih, (3 * hidden_size,),
                                   jnp.float32, -bound, bound),
        "b_hh": jax.random.uniform(k_bhh, (3 * hidden_size,),
                                   jnp.float32, -bound, bound),
    }


def prepare_kernel_params(raw):
    """Pad H to 128 lanes, fuse/transpose GRU weights, cast weights to bf16.

    Fused weight layout (2Hp, 4Hp), column groups [r | z | n_input | n_hidden]:
        rows [0:H)      = input->gate weights (transposed)
        rows [Hp:Hp+H)  = hidden->gate weights (transposed)
    Padded lanes are zero-weight / zero-bias, so they stay exactly 0 in the
    hidden state as long as the initial hidden padding is 0.
    """
    emb = raw["embedding"]
    V, H = emb.shape
    Hp = max(LANE, _round_up(H, LANE))

    w_ih, w_hh = raw["w_ih"], raw["w_hh"]            # (3H, H), gate order r,z,n
    w_ir, w_iz, w_in = w_ih[:H], w_ih[H:2 * H], w_ih[2 * H:]
    w_hr, w_hz, w_hn = w_hh[:H], w_hh[H:2 * H], w_hh[2 * H:]
    b_ih, b_hh = raw["b_ih"], raw["b_hh"]

    W = jnp.zeros((2 * Hp, 4 * Hp), jnp.float32)
    W = W.at[:H, 0:H].set(w_ir.T)
    W = W.at[:H, Hp:Hp + H].set(w_iz.T)
    W = W.at[:H, 2 * Hp:2 * Hp + H].set(w_in.T)
    W = W.at[Hp:Hp + H, 0:H].set(w_hr.T)
    W = W.at[Hp:Hp + H, Hp:Hp + H].set(w_hz.T)
    W = W.at[Hp:Hp + H, 3 * Hp:3 * Hp + H].set(w_hn.T)

    b = jnp.zeros((1, 4 * Hp), jnp.float32)
    b = b.at[0, 0:H].set(b_ih[:H] + b_hh[:H])                    # r bias (pre-summed)
    b = b.at[0, Hp:Hp + H].set(b_ih[H:2 * H] + b_hh[H:2 * H])    # z bias (pre-summed)
    b = b.at[0, 2 * Hp:2 * Hp + H].set(b_ih[2 * H:])             # n input bias
    b = b.at[0, 3 * Hp:3 * Hp + H].set(b_hh[2 * H:])             # n hidden bias

    emb_pad = jnp.zeros((V, 1, Hp), jnp.float32)
    emb_pad = emb_pad.at[:, 0, :H].set(emb)

    return {
        "emb_pad": emb_pad.astype(jnp.bfloat16),
        "w_big": W.astype(jnp.bfloat16),
        "b_big": b,
        "hp": Hp,
        "hidden_size": H,
    }


def _reference_forward(tokens, hidden0, raw):
    """Pure-JAX reference (same bf16-weight / f32-accumulate numerics)."""
    H = raw["embedding"].shape[1]
    emb = raw["embedding"].astype(jnp.bfloat16)
    w_ih_t = raw["w_ih"].T.astype(jnp.bfloat16)      # (H, 3H)
    w_hh_t = raw["w_hh"].T.astype(jnp.bfloat16)
    b_ih = raw["b_ih"].reshape(1, 3 * H)
    b_hh = raw["b_hh"].reshape(1, 3 * H)

    def step(h, tok):
        x = emb[tok].reshape(1, H)
        gi = jnp.dot(x, w_ih_t, preferred_element_type=jnp.float32) + b_ih
        gh = jnp.dot(h.astype(jnp.bfloat16), w_hh_t,
                     preferred_element_type=jnp.float32) + b_hh
        r = jax.nn.sigmoid(gi[:, :H] + gh[:, :H])
        z = jax.nn.sigmoid(gi[:, H:2 * H] + gh[:, H:2 * H])
        n = jnp.tanh(gi[:, 2 * H:] + r * gh[:, 2 * H:])
        h_new = (1.0 - z) * n + z * h
        return h_new, h_new

    tokens = jnp.asarray(tokens, dtype=jnp.int32).reshape(-1)
    h_final, outs = jax.lax.scan(step, hidden0.reshape(1, H).astype(jnp.float32),
                                 tokens)
    return outs.reshape(-1, 1, H), h_final.reshape(1, 1, H)


if __name__ == "__main__":
    input_size = 10       # vocab size
    hidden_size = 32
    seq_len = 8

    key = jax.random.PRNGKey(0)
    raw_params = init_params(input_size, hidden_size, key)
    params = prepare_kernel_params(raw_params)

    tokens = jax.random.randint(jax.random.PRNGKey(1), (seq_len,), 0, input_size,
                                dtype=jnp.int32)
    hidden0 = jnp.zeros((1, 1, hidden_size), jnp.float32)   # EncoderRNN.initHidden()

    # Full-sequence encoder pass (one pallas_call, weights resident in VMEM).
    outputs, hidden_T = encoder_rnn_forward(tokens, hidden0, params)
    jax.block_until_ready((outputs, hidden_T))

    ref_outputs, ref_hidden = _reference_forward(tokens, hidden0, raw_params)

    assert outputs.shape == (seq_len, 1, hidden_size)
    assert hidden_T.shape == (1, 1, hidden_size)
    assert jnp.allclose(outputs, ref_outputs, atol=1e-3, rtol=1e-3)
    assert jnp.allclose(hidden_T, ref_hidden, atol=1e-3, rtol=1e-3)

    # Single-step path: exact EncoderRNN.forward(input, hidden) semantics.
    out1, h1 = encoder_rnn_step(tokens[0], hidden0, params)
    assert out1.shape == (1, 1, hidden_size)
    assert h1.shape == (1, 1, hidden_size)
    assert jnp.allclose(out1, ref_outputs[0:1], atol=1e-3, rtol=1e-3)
    assert jnp.allclose(h1, ref_outputs[0].reshape(1, 1, hidden_size),
                        atol=1e-3, rtol=1e-3)

    print("KERNEL_OK")
</pallas_src>

<mosaic_0001>
module attributes {stable_mosaic.version = 11 : i64} {
  func.func @_encoder_gru_seq_kernel(%arg0: i32, %arg1: memref<8xi32, #tpu.memory_space<smem>>, %arg2: memref<1x1x128xbf16, #tpu.memory_space<vmem>>, %arg3: memref<1x128xf32, #tpu.memory_space<vmem>>, %arg4: memref<256x512xbf16, #tpu.memory_space<vmem>>, %arg5: memref<1x512xf32, #tpu.memory_space<vmem>>, %arg6: memref<1x1x128xf32, #tpu.memory_space<vmem>>, %arg7: memref<1x128xf32, #tpu.memory_space<vmem>>) attributes {dimension_semantics = [#tpu.dimension_semantics<arbitrary>], iteration_bounds = array<i64: 8>, scalar_prefetch = 1 : i64, scratch_operands = 1 : i64, tpu.core_type = #tpu.core_type<tc>, window_params = [{transform_indices = @transform_0, window_bounds = array<i64: 1, 1, 128>}, {pipeline_mode = #tpu.pipeline_mode<synchronous>, transform_indices = @transform_1, window_bounds = array<i64: 1, 128>}, {pipeline_mode = #tpu.pipeline_mode<synchronous>, transform_indices = @transform_2, window_bounds = array<i64: 256, 512>}, {pipeline_mode = #tpu.pipeline_mode<synchronous>, transform_indices = @transform_3, window_bounds = array<i64: 1, 512>}, {transform_indices = @transform_4, window_bounds = array<i64: 1, 1, 128>}]} {
    %c0_i32 = arith.constant 0 : i32
    %0 = arith.cmpi eq, %arg0, %c0_i32 : i32
    %1 = arith.extui %0 : i1 to i32
    %c0_i32_0 = arith.constant 0 : i32
    %2 = arith.cmpi ne, %1, %c0_i32_0 : i32
    scf.if %2 {
      %c0_17 = arith.constant 0 : index
      %c0_18 = arith.constant 0 : index
      %38 = vector.load %arg3[%c0_17, %c0_18] : memref<1x128xf32, #tpu.memory_space<vmem>>, vector<1x128xf32>
      %c0_19 = arith.constant 0 : index
      %c0_20 = arith.constant 0 : index
      %39 = vector.load %arg7[%c0_19, %c0_20] : memref<1x128xf32, #tpu.memory_space<vmem>>, vector<1x128xf32>
      tpu.vector_store %arg7[%c0_19, %c0_20], %38 {strides = array<i32>} : memref<1x128xf32, #tpu.memory_space<vmem>>, vector<1x128xf32>,
    } else {
    }
    %c0 = arith.constant 0 : index
    %c0_1 = arith.constant 0 : index
    %3 = vector.load %arg7[%c0, %c0_1] : memref<1x128xf32, #tpu.memory_space<vmem>>, vector<1x128xf32>
    %c0_2 = arith.constant 0 : index
    %c0_3 = arith.constant 0 : index
    %c0_4 = arith.constant 0 : index
    %4 = vector.load %arg2[%c0_2, %c0_3, %c0_4] : memref<1x1x128xbf16, #tpu.memory_space<vmem>>, vector<1x1x128xbf16>
    %5 = vector.shape_cast %4 : vector<1x1x128xbf16> to vector<1x128xbf16>
    %6 = arith.truncf %3 : vector<1x128xf32> to vector<1x128xbf16>
    %7 = tpu.concatenate %5, %6 in 1 : vector<1x128xbf16>, vector<1x128xbf16> -> vector<1x256xbf16>
    %c0_5 = arith.constant 0 : index
    %c0_6 = arith.constant 0 : index
    %8 = vector.load %arg4[%c0_5, %c0_6] : memref<256x512xbf16, #tpu.memory_space<vmem>>, vector<256x512xbf16>
    %cst = arith.constant dense<0.000000e+00> : vector<1x512xf32>
    %9 = tpu.matmul %7, %8, %cst {dimension_numbers = #tpu.dot_dimension_numbers<[1], [0], [0], [1], [0, 0, 1, 1], [], []>} : vector<1x256xbf16>, vector<256x512xbf16>, vector<1x512xf32> -> vector<1x512xf32>
    %c0_7 = arith.constant 0 : index
    %c0_8 = arith.constant 0 : index
    %10 = vector.load %arg5[%c0_7, %c0_8] : memref<1x512xf32, #tpu.memory_space<vmem>>, vector<1x512xf32>
    %11 = arith.addf %9, %10 : vector<1x512xf32>
    %12 = vector.extract_strided_slice %11 {offsets = [0, 0], sizes = [1, 128], strides = [1, 1]} : vector<1x512xf32> to vector<1x128xf32>
    %13 = arith.negf %12 : vector<1x128xf32>
    %14 = math.exp %13 : vector<1x128xf32>
    %cst_9 = arith.constant 1.000000e+00 : f32
    %15 = vector.broadcast %cst_9 : f32 to vector<1x128xf32>
    %16 = arith.addf %15, %14 : vector<1x128xf32>
    %17 = arith.divf %15, %16 : vector<1x128xf32>
    %18 = vector.extract_strided_slice %11 {offsets = [0, 128], sizes = [1, 128], strides = [1, 1]} : vector<1x512xf32> to vector<1x128xf32>
    %19 = arith.negf %18 : vector<1x128xf32>
    %20 = math.exp %19 : vector<1x128xf32>
    %cst_10 = arith.constant 1.000000e+00 : f32
    %21 = vector.broadcast %cst_10 : f32 to vector<1x128xf32>
    %22 = arith.addf %21, %20 : vector<1x128xf32>
    %23 = arith.divf %21, %22 : vector<1x128xf32>
    %24 = vector.extract_strided_slice %11 {offsets = [0, 256], sizes = [1, 128], strides = [1, 1]} : vector<1x512xf32> to vector<1x128xf32>
    %25 = vector.extract_strided_slice %11 {offsets = [0, 384], sizes = [1, 128], strides = [1, 1]} : vector<1x512xf32> to vector<1x128xf32>
    %26 = arith.mulf %17, %25 : vector<1x128xf32>
    %27 = arith.addf %24, %26 : vector<1x128xf32>
    %28 = math.tanh %27 : vector<1x128xf32>
    %cst_11 = arith.constant 1.000000e+00 : f32
    %29 = vector.broadcast %cst_11 : f32 to vector<1x128xf32>
    %30 = arith.subf %29, %23 : vector<1x128xf32>
    %31 = arith.mulf %30, %28 : vector<1x128xf32>
    %32 = arith.mulf %23, %3 : vector<1x128xf32>
    %33 = arith.addf %31, %32 : vector<1x128xf32>
    %c0_12 = arith.constant 0 : index
    %c0_13 = arith.constant 0 : index
    %34 = vector.load %arg7[%c0_12, %c0_13] : memref<1x128xf32, #tpu.memory_space<vmem>>, vector<1x128xf32>
    tpu.vector_store %arg7[%c0_12, %c0_13], %33 {strides = array<i32>} : memref<1x128xf32, #tpu.memory_space<vmem>>, vector<1x128xf32>,
    %c0_14 = arith.constant 0 : index
    %c0_15 = arith.constant 0 : index
    %c0_16 = arith.constant 0 : index
    %35 = vector.load %arg6[%c0_14, %c0_15, %c0_16] : memref<1x1x128xf32, #tpu.memory_space<vmem>>, vector<1x1x128xf32>
    %36 = vector.shape_cast %35 : vector<1x1x128xf32> to vector<1x128xf32>
    %37 = vector.shape_cast %33 : vector<1x128xf32> to vector<1x1x128xf32>
    tpu.vector_store %arg6[%c0_14, %c0_15, %c0_16], %37 {strides = array<i32>} : memref<1x1x128xf32, #tpu.memory_space<vmem>>, vector<1x1x128xf32>,
    return
  }
  func.func @transform_0(%arg0: i32, %arg1: memref<8xi32, #tpu.memory_space<smem>>) -> (i32, i32, i32) {
    %0 = arith.index_cast %arg0 : i32 to index
    %1 = memref.load %arg1[%0] : memref<8xi32, #tpu.memory_space<smem>>
    %c0_i32 = arith.constant 0 : i32
    %c0_i32_0 = arith.constant 0 : i32
    %c0_i32_1 = arith.constant 0 : i32
    return %1, %c0_i32, %c0_i32_0 : i32, i32, i32
  }
  func.func @transform_1(%arg0: i32, %arg1: memref<8xi32, #tpu.memory_space<smem>>) -> (i32, i32) {
    %c0_i32 = arith.constant 0 : i32
    %c0_i32_0 = arith.constant 0 : i32
    %c0_i32_1 = arith.constant 0 : i32
    return %c0_i32, %c0_i32_0 : i32, i32
  }
  func.func @transform_2(%arg0: i32, %arg1: memref<8xi32, #tpu.memory_space<smem>>) -> (i32, i32) {
    %c0_i32 = arith.constant 0 : i32
    %c0_i32_0 = arith.constant 0 : i32
    %c0_i32_1 = arith.constant 0 : i32
    return %c0_i32, %c0_i32_0 : i32, i32
  }
  func.func @transform_3(%arg0: i32, %arg1: memref<8xi32, #tpu.memory_space<smem>>) -> (i32, i32) {
    %c0_i32 = arith.constant 0 : i32
    %c0_i32_0 = arith.constant 0 : i32
    %c0_i32_1 = arith.constant 0 : i32
    return %c0_i32, %c0_i32_0 : i32, i32
  }
  func.func @transform_4(%arg0: i32, %arg1: memref<8xi32, #tpu.memory_space<smem>>) -> (i32, i32, i32) {
    %c0_i32 = arith.constant 0 : i32
    %c0_i32_0 = arith.constant 0 : i32
    %c0_i32_1 = arith.constant 0 : i32
    return %arg0, %c0_i32, %c0_i32_0 : i32, i32, i32
  }
}

</mosaic_0001>

<bundles_post_ra>
// kernel: tpu_custom_call.1
= control target key start
LH: loop header
LB: loop body
LE: loop exit
PB: predicated region body
PF: predicated region fallthrough
CT: control target
= control target key end

     0   :  { %s1360_s0 = inlined_call_operand.vmem [shape: s32[8], index: 0, kind: input, shape index: {}]   ;;  %s1361_s1 = inlined_call_operand.vmem [shape: bf16[10,1,128], index: 1, kind: input, shape index: {}]   ;;  %s1362_s2 = inlined_call_operand.vmem [shape: f32[1,128], index: 2, kind: input, shape index: {}]   ;;  %s1363_s3 = inlined_call_operand.hbm [shape: bf16[256,512], index: 3, kind: input, shape index: {}]   ;;  %s1364_s4 = inlined_call_operand.vmem [shape: f32[1,512], index: 4, kind: input, shape index: {}]   ;;  %s1365_s5 = inlined_call_operand.hbm [shape: f32[8,1,128], index: 5, kind: output, shape index: {}]  }
   0x1   :  { %s10_s20 = sshll.u32 %s1360_s0, 4  ;;  %s11_s20 = int_to_ptr.vmem [resolvable:$true] %s10_s20 }
   0x2   :  { %s1048_s21 = scalar_lea.vmem %s11_s20, 16  ;;  %p1053_p1 = scmp.lt.s32.totalorder %s11_s20, %s11_s20 }
   0x3   :  { %p1049_p0 = scmp.ne.s32.totalorder %s11_s20, %s1048_s21  ;;  %p1054_p2 = scmp.lt.s32.totalorder %s1048_s21, %s1048_s21 }
   0x5   :  { %p1055_p3 = por %p1054_p2, %p1053_p1 }
   0x7   :  { %p1056_p4 = pnand %p1055_p3, %p1049_p0 }
   0x9   :  { %1059 = shalt.err (!%p1056_p4)  }
   0xa   :  { %s1158_s22 = smov [#allocation4]  }
   0xb   :  { %13 = dma.vmem_to_smem %s11_s20, 16, %s1158_s22, [#allocation3] }
   0xc   :  { %1132 = dma.done.wait [#allocation3], 16 }
   0xd   :  { %1133 = vsyncadd [#allocation3], 4294967280 }
   0xe   :  { %15 = sfence }
   0xf   :  { %16 = vsyncpa [#allocation6], 0 }
  0x10   :  { %17 = vsyncpa [#allocation7], 0 }
  0x11   :  { %19 = vsyncpa [#allocation7 + $0x1], 0  ;;  %s1196_s23 = smov 0   ;;  %s1198_s24 = smov 0  }
  0x12   :  { %s1200_s0 = smov 0   ;;  %s1202_s25 = smov 0  }
  0x13 LB: > { %s1217_s26 = sadd.s32 4294967295, %s1156_s25   ;;  %s813_s27 = sadd.s32 4294967294, %s1156_s25   ;;  %s1156_s25 = sphi %s1202_s25, %s1382_s25   ;;  %s1152_s0 = sphi %s1200_s0, %s1381_s0   ;;  %s1148_s24 = sphi %s1198_s24, %s1380_s24   ;;  %s1144_s23 = sphi %s1196_s23, %s1379_s23  }
  0x14   : > { %s1221_s28 = sadd.s32 1, %s1156_s25   ;;  %s123_s29 = sadd.s32 1, %s1152_s0 }
  0x15   : > { %s120_s30 = ssub.s32 %s1156_s25, %s1221_s28  ;;  %p133_p5 = scmp.ne.s32.totalorder %s1152_s0, %s1148_s24 }
  0x16   : > { %p121_p6 = scmp.eq.s32.totalorder %s120_s30, 0  ;;  %p134_p7 = scmp.eq.s32.totalorder %s1217_s26, 7 }
  0x17   : > { %p139_p8 = scmp.ne.s32.totalorder %s1148_s24, %s1144_s23  ;;  %p140_p9 = scmp.eq.s32.totalorder %s813_s27, 7 }
  0x18   : > { %s1232_s6 = scalar_select %p121_p6, %s1152_s0, %s123_s29  }
  0x19   : > { %p1234_p10 = por %p134_p7, %p133_p5  ;;  %p1238_p11 = por %p140_p9, %p139_p8 }
  0x1a   : > { %p814_p12 = scmp.ge.s32.totalorder %s1156_s25, 1  ;;  %p147_p13 = scmp.lt.s32.totalorder %s1156_s25, 9 }
  0x1b   : > { %s1369_s7 = scalar_select %p1234_p10, 1, 0 }
  0x1c   : > { %s1370_s8 = scalar_select %p1238_p11, 1, 0 }
  0x1d   : > { %p1366_p1 = scmp.eq.s32.totalorder %s1217_s26, 0  ;;  %p1246_p2 = pnand %p814_p12, %p147_p13 }
  0x1e   : > { %s1159_s10 = smov [#allocation5]   ;;  %s1060_s15 = scalar_lea.hbm %s1363_s3, 8192 }
  0x1f   : > { %s1371_s9 = scalar_select %p1246_p2, 1, 0 }
  0x20   : > { %s162_s11 = sshll.u32 %s1159_s10, 4  ;;  %p895_p3 = pneg %p1246_p2  ;;  %s163_s11 = int_to_ptr.vmem [resolvable:$true] %s162_s11 }
  0x21   : > { %p1061_p5 = scmp.ne.s32.totalorder %s1363_s3, %s1060_s15  ;;  %p1067_p9 = scmp.lt.u32.totalorder %s1060_s15, %s1363_s3 }
  0x22   : > { %p1254_p4 = pnand %p1366_p1, %p895_p3 }
  0x24   : > { %p1062_p6 = pneg %p1254_p4 }
  0x26   : > { %p1063_p7 = pnand %p1062_p6, %p1061_p5 }
  0x28   : > { %p1064_p8 = pneg %p1063_p7 }
  0x2a   : > { %p1069_p12 = pnand %p1067_p9, %p1064_p8 }
  0x2c   : > { %1072 = shalt.err (!%p1069_p12)
}
  0x2d   : > { %s1073_s20 = scalar_lea.vmem %s163_s11, 8192  ;;  %p1081_p1 = scmp.lt.s32.totalorder %s163_s11, %s163_s11 }
  0x2e   : > { %p1074_p13 = scmp.ne.s32.totalorder %s163_s11, %s1073_s20  ;;  %p1082_p11 = scmp.lt.s32.totalorder %s1073_s20, %s1073_s20 }
  0x30   : > { %p1076_p3 = pnand %p1074_p13, %p1062_p6  ;;  %p1083_p10 = por %p1082_p11, %p1081_p1 }
  0x32   : > { %p1077_p0 = pneg %p1076_p3 }
  0x34   : > { %p1084_p2 = pnand %p1083_p10, %p1077_p0 }
  0x36   : > { %1087 = shalt.err (!%p1084_p2)
}
  0x37   : > { %s1160_s21 = smov 256   ;;  %s1161_s22 = smov 16  }
  0x38   : > { %898 = dma.hbm_to_vmem [thread:$0]  (!%p1254_p4), %s1363_s3, 8192, %s163_s11, [#allocation6], %s1160_s21, %s1160_s21, %s1161_s22  }
  0x39   : > { %p1373_p5 = scmp.ne.s32.totalorder %s1371_s9, 0 }
  0x3a   : > { %p1374_p7 = scmp.eq.s32.totalorder (!%p1373_p5), %s1217_s26, 0 }
  0x3b   : > { %189 = sbr.rel (%p1373_p5) target bundleno = 415 (0x19f), region = 36 }
  0x42   : > { %1135 = dma.done.wait (%p1374_p7), [#allocation6], 8192   ;;  %p1375_p6 = pmov %p1374_p7 }
  0x43   : > { %s211_s30 = sand.u32 1, %s1148_s24   ;;  %s213_s10 = sld [smem:[#allocation4 + %s1217_s26]] }
  0x44   : > { %1137 = vsyncadd (%p1375_p6), [#allocation6], 4294959104  ;;  %s1290_s13 = scalar_lea.vmem [#allocation8], %s211_s30  ;;  %p1376_p11 = scmp.ne.s32.totalorder %s1217_s26, 0 }
  0x45   : > { %v222_v0 = vld [vmem:[%s1362_s2] sm:$0x1] (!%p1376_p11) }
  0x46   : > { %221 = sbr.rel (%p1376_p11) target bundleno = 77 (0x4d), region = 44  ;;  %223 = vst [vmem:[#allocation2] sm:$0x1] (!%p1376_p11), %v222_v0 }
  0x49   : > { %p214_p10 = scmp.lt.s32.totalorder %s213_s10, 9 }
  0x4b   : > { %s1384_s10 = smov (!%p214_p10, %s213_s10), 9 }
  0x4c   : > { %s216_s9 = scalar_lea.vmem %s1361_s1, %s1384_s10 }
  0x4d PF: > { %v942_v1 = vld [vmem:[#allocation5 + $0x4] ss:$16 sps:$4 sm:$0xff]   ;;  %v944_v2 = vld [vmem:[#allocation5] ss:$16 sps:$4 sm:$0xff]   ;;  %v960_v8 = vld [vmem:[#allocation5 + $0xc] ss:$16 sps:$4 sm:$0xff]  }
  0x4e   : > { %633 = vmatprep.subr.bf16.mxu0 %v942_v1  ;;  %v945_v3 = vld [vmem:[#allocation5 + $0x24] ss:$16 sps:$4 sm:$0xff]   ;;  %v947_v4 = vld [vmem:[#allocation5 + $0x20] ss:$16 sps:$4 sm:$0xff]   ;;  %v962_v9 = vld [vmem:[#allocation5 + $0x8] ss:$16 sps:$4 sm:$0xff]   ;;  %674 = vmatprep.subr.bf16.mxu1 %v960_v8 }
  0x4f   : > { %634 = vmatpush1.bf16.msra.mxu0 %v944_v2  ;;  %v948_v5 = vld [vmem:[#allocation5 + $0x44] ss:$16 sps:$4 sm:$0xff]   ;;  %v950_v6 = vld [vmem:[#allocation5 + $0x40] ss:$16 sps:$4 sm:$0xff]   ;;  %675 = vmatpush1.bf16.msra.mxu1 %v962_v9  ;;  %v966_v11 = vld [vmem:[#allocation5 + $0x2c] ss:$16 sps:$4 sm:$0xff]  }
  0x50   : > { %635 = vmatprep.subr.bf16.mxu0 %v945_v3  ;;  %v951_v7 = vld [vmem:[#allocation5 + $0x64] ss:$16 sps:$4 sm:$0xff]   ;;  %v953_v10 = vld [vmem:[#allocation5 + $0x60] ss:$16 sps:$4 sm:$0xff]   ;;  %v968_v12 = vld [vmem:[#allocation5 + $0x28] ss:$16 sps:$4 sm:$0xff]   ;;  %676 = vmatprep.subr.bf16.mxu1 %v966_v11 }
  0x51   : > { %v954_v13 = vld [vmem:[#allocation5 + $0x84] ss:$16 sps:$4 sm:$0xff]   ;;  %v956_v14 = vld [vmem:[#allocation5 + $0x80] ss:$16 sps:$4 sm:$0xff]   ;;  %v972_v15 = vld [vmem:[#allocation5 + $0x4c] ss:$16 sps:$4 sm:$0xff]  }
  0x52   : > { %v957_v16 = vld [vmem:[#allocation5 + $0xa4] ss:$16 sps:$4 sm:$0xff]   ;;  %v974_v17 = vld [vmem:[#allocation5 + $0x48] ss:$16 sps:$4 sm:$0xff]   ;;  %v978_v18 = vld [vmem:[#allocation5 + $0x6c] ss:$16 sps:$4 sm:$0xff]  }
  0x53   : > { %636 = vmatpush1.bf16.msra.mxu0 %v947_v4  ;;  %677 = vmatpush1.bf16.msra.mxu1 %v968_v12  ;;  %v959_v19 = vld [vmem:[#allocation5 + $0xa0] ss:$16 sps:$4 sm:$0xff]   ;;  %v963_v20 = vld [vmem:[#allocation5 + $0xc4] ss:$16 sps:$4 sm:$0xff]   ;;  %v980_v21 = vld [vmem:[#allocation5 + $0x68] ss:$16 sps:$4 sm:$0xff]   ;;  %v613_v4 = vlaneseq }
  0x54   : > { %637 = vmatprep.subr.bf16.mxu0 %v948_v5  ;;  %678 = vmatprep.subr.bf16.mxu1 %v972_v15  ;;  %v984_v22 = vld [vmem:[#allocation5 + $0x8c] ss:$16 sps:$4 sm:$0xff]   ;;  %v965_v23 = vld [vmem:[#allocation5 + $0xc0] ss:$16 sps:$4 sm:$0xff]   ;;  %v969_v24 = vld [vmem:[#allocation5 + $0xe4] ss:$16 sps:$4 sm:$0xff]  }
  0x55   : > { %v986_v25 = vld [vmem:[#allocation5 + $0x88] ss:$16 sps:$4 sm:$0xff]   ;;  %v990_v26 = vld [vmem:[#allocation5 + $0xac] ss:$16 sps:$4 sm:$0xff]   ;;  %v971_v27 = vld [vmem:[#allocation5 + $0xe0] ss:$16 sps:$4 sm:$0xff]  }
  0x56   : > { %v975_v28 = vld [vmem:[#allocation5 + $0x104] ss:$16 sps:$4 sm:$0xff]   ;;  %v992_v29 = vld [vmem:[#allocation5 + $0xa8] ss:$16 sps:$4 sm:$0xff]   ;;  %v996_v30 = vld [vmem:[#allocation5 + $0xcc] ss:$16 sps:$4 sm:$0xff]  }
  0x57   : > { %638 = vmatpush1.bf16.msra.mxu0 %v950_v6  ;;  %679 = vmatpush1.bf16.msra.mxu1 %v974_v17  ;;  %v977_v31 = vld [vmem:[#allocation5 + $0x100] ss:$16 sps:$4 sm:$0xff]   ;;  %v981_v32 = vld [vmem:[#allocation5 + $0x124] ss:$16 sps:$4 sm:$0xff]   ;;  %v998_v33 = vld [vmem:[#allocation5 + $0xc8] ss:$16 sps:$4 sm:$0xff]  }
  0x58   : > { %639 = vmatprep.subr.bf16.mxu0 %v951_v7  ;;  %680 = vmatprep.subr.bf16.mxu1 %v978_v18  ;;  %v1002_v34 = vld [vmem:[#allocation5 + $0xec] ss:$16 sps:$4 sm:$0xff]   ;;  %v983_v35 = vld [vmem:[#allocation5 + $0x120] ss:$16 sps:$4 sm:$0xff]   ;;  %v1004_v36 = vld [vmem:[#allocation5 + $0xe8] ss:$16 sps:$4 sm:$0xff]  }
  0x59   : > { %v1297_v37 = vld [vmem:[#allocation2] sm:$0x1]  ;;  %v987_v38 = vld [vmem:[#allocation5 + $0x144] ss:$16 sps:$4 sm:$0xff]   ;;  %v989_v41 = vld [vmem:[#allocation5 + $0x140] ss:$16 sps:$4 sm:$0xff]  }
  0x5a   : > { %v1008_v39 = vld [vmem:[#allocation5 + $0x10c] ss:$16 sps:$4 sm:$0xff]   ;;  %v226_v40 = vpack.c.bf16 %v1297_v37, %v1297_v37  ;;  %v1010_v42 = vld [vmem:[#allocation5 + $0x108] ss:$16 sps:$4 sm:$0xff]   ;;  %v993_v43 = vld [vmem:[#allocation5 + $0x164] ss:$16 sps:$4 sm:$0xff]  }
  0x5b   : > { %640 = vmatpush1.bf16.msra.mxu0 %v953_v10  ;;  %681 = vmatpush1.bf16.msra.mxu1 %v980_v21  ;;  %v1014_v44 = vld [vmem:[#allocation5 + $0x12c] ss:$16 sps:$4 sm:$0xff]   ;;  %v995_v45 = vld [vmem:[#allocation5 + $0x160] ss:$16 sps:$4 sm:$0xff]   ;;  %v1016_v46 = vld [vmem:[#allocation5 + $0x128] ss:$16 sps:$4 sm:$0xff]  }
  0x5c   : > { %641 = vmatprep.subr.bf16.mxu0 %v954_v13  ;;  %682 = vmatprep.subr.bf16.mxu1 %v984_v22  ;;  %v999_v47 = vld [vmem:[#allocation5 + $0x184] ss:$16 sps:$4 sm:$0xff]   ;;  %v1020_v48 = vld [vmem:[#allocation5 + $0x14c] ss:$16 sps:$4 sm:$0xff]   ;;  %v1001_v49 = vld [vmem:[#allocation5 + $0x180] ss:$16 sps:$4 sm:$0xff]  }
  0x5d   : > { %665 = vmatprep.mubr.bf16.mxu0 %v226_v40  ;;  %706 = vmatprep.mubr.bf16.mxu1 %v226_v40  ;;  %v1022_v50 = vld [vmem:[#allocation5 + $0x148] ss:$16 sps:$4 sm:$0xff]   ;;  %v1005_v51 = vld [vmem:[#allocation5 + $0x1a4] ss:$16 sps:$4 sm:$0xff]   ;;  %v1023_v52 = vld [vmem:[#allocation5 + $0x16c] ss:$16 sps:$4 sm:$0xff]  }
  0x5e   : > { %v1007_v53 = vld [vmem:[#allocation5 + $0x1a0] ss:$16 sps:$4 sm:$0xff]   ;;  %v1025_v54 = vld [vmem:[#allocation5 + $0x168] ss:$16 sps:$4 sm:$0xff]   ;;  %v1011_v55 = vld [vmem:[#allocation5 + $0x1c4] ss:$16 sps:$4 sm:$0xff]  }
  0x5f   : > { %642 = vmatpush1.bf16.msra.mxu0 %v956_v14  ;;  %683 = vmatpush1.bf16.msra.mxu1 %v986_v25  ;;  %v1026_v56 = vld [vmem:[#allocation5 + $0x18c] ss:$16 sps:$4 sm:$0xff]   ;;  %v1013_v57 = vld [vmem:[#allocation5 + $0x1c0] ss:$16 sps:$4 sm:$0xff]   ;;  %v1028_v58 = vld [vmem:[#allocation5 + $0x188] ss:$16 sps:$4 sm:$0xff]  }
  0x60   : > { %643 = vmatprep.subr.bf16.mxu0 %v957_v16  ;;  %684 = vmatprep.subr.bf16.mxu1 %v990_v26  ;;  %v1017_v59 = vld [vmem:[#allocation5 + $0x1e4] ss:$16 sps:$4 sm:$0xff]   ;;  %v1029_v60 = vld [vmem:[#allocation5 + $0x1ac] ss:$16 sps:$4 sm:$0xff]   ;;  %v1019_v61 = vld [vmem:[#allocation5 + $0x1e0] ss:$16 sps:$4 sm:$0xff]  }
  0x61   : > { %v1031_v62 = vld [vmem:[#allocation5 + $0x1a8] ss:$16 sps:$4 sm:$0xff]   ;;  %v1032_v63 = vld [vmem:[#allocation5 + $0x1cc] ss:$16 sps:$4 sm:$0xff]   ;;  %v614_v5 = vshrl.u32 %v613_v4, 7  ;;  %s886_s20 = sshll.u32 %s1217_s26, 4 }
  0x62   : > { %v225_v0 = vld [vmem:[%s216_s9] sm:$0x1]  ;;  %v1034_v1 = vld [vmem:[#allocation5 + $0x1c8] ss:$16 sps:$4 sm:$0xff]   ;;  %s749_s21 = sshll.u32 %s1290_s13, 4  ;;  %s1315_s29 = scalar_lea.hbm %s1365_s5, %s886_s20  ;;  %s1317_s21 = int_to_ptr.vmem [resolvable:$true] %s749_s21 }
  0x63   : > { %644 = vmatpush1.bf16.msra.mxu0 %v959_v19  ;;  %685 = vmatpush1.bf16.msra.mxu1 %v992_v29  ;;  %v1035_v2 = vld [vmem:[#allocation5 + $0x1ec] ss:$16 sps:$4 sm:$0xff]   ;;  %v1037_v3 = vld [vmem:[#allocation5 + $0x1e8] ss:$16 sps:$4 sm:$0xff]   ;;  %v615_v6 = vsub.s32 0, %v614_v5  ;;  %v619_v8 = vsub.s32 1, %v614_v5 }
  0x64   : > { %645 = vmatprep.subr.bf16.mxu0 %v963_v20  ;;  %686 = vmatprep.subr.bf16.mxu1 %v996_v30  ;;  %v291_v7 = vld [vmem:[%s1364_s4] sm:$0xf]  ;;  %v627_v25 = vsub.s32 3, %v614_v5  ;;  %v623_v26 = vsub.s32 2, %v614_v5  ;;  %s737_s10 = scalar_lea.sflag [#allocation7], %s211_s30  ;;  %s1088_s26 = scalar_lea.vmem %s1317_s21, 16 }
  0x65   : > { %v616_v9 = vrot.slane %v291_v7, %v615_v6  ;;  %v620_v11 = vrot.slane %v291_v7, %v619_v8  ;;  %p1089_p0 = scmp.ne.s32.totalorder %s1317_s21, %s1088_s26  ;;  %p1377_p1 = scmp.ne.s32.totalorder %s1369_s7, 0 }
  0x66   : > { %v624_v30 = vrot.slane %v291_v7, %v623_v26  ;;  %s1162_s12 = smov [#allocation8]  }
  0x67   : > { %646 = vmatpush1.bf16.msra.mxu0 %v965_v23  ;;  %687 = vmatpush1.bf16.msra.mxu1 %v998_v33  ;;  %p1090_p2 = pnand %p1089_p0, %p1377_p1  ;;  %s1092_s11 = sshll.u32 %s1162_s12, 4  ;;  %s1093_s11 = int_to_ptr.vmem [resolvable:$false] %s1092_s11 }
  0x68   : > { %647 = vmatprep.subr.bf16.mxu0 %v969_v24  ;;  %688 = vmatprep.subr.bf16.mxu1 %v1002_v34  ;;  %s1094_s9 = scalar_lea.vmem %s1093_s11, 32  ;;  %p1095_p8 = scmp.lt.s32.totalorder %s1317_s21, %s1093_s11 }
  0x69   : > { %p1091_p4 = pneg %p1090_p2  ;;  %p1096_p9 = scmp.lt.s32.totalorder %s1094_s9, %s1088_s26 }
  0x6b   : > { %648 = vmatpush1.bf16.msra.mxu0 %v971_v27  ;;  %689 = vmatpush1.bf16.msra.mxu1 %v1004_v36  ;;  %v628_v27 = vrot.slane %v291_v7, %v627_v25  ;;  %p1097_p12 = por %p1096_p9, %p1095_p8 }
  0x6c   : > { %649 = vmatprep.subr.bf16.mxu0 %v975_v28  ;;  %690 = vmatprep.subr.bf16.mxu1 %v1008_v39 }
  0x6d   : > { %p1098_p13 = pnand %p1097_p12, %p1091_p4 }
  0x6f   : > { %650 = vmatpush1.bf16.msra.mxu0 %v977_v31  ;;  %691 = vmatpush1.bf16.msra.mxu1 %v1010_v42 }
  0x70   : > { %651 = vmatprep.subr.bf16.mxu0 %v981_v32  ;;  %692 = vmatprep.subr.bf16.mxu1 %v1014_v44 }
  0x73   : > { %652 = vmatpush1.bf16.msra.mxu0 %v983_v35  ;;  %693 = vmatpush1.bf16.msra.mxu1 %v1016_v46 }
  0x74   : > { %653 = vmatprep.subr.bf16.mxu0 %v987_v38  ;;  %694 = vmatprep.subr.bf16.mxu1 %v1020_v48 }
  0x77   : > { %654 = vmatpush1.bf16.msra.mxu0 %v989_v41  ;;  %695 = vmatpush1.bf16.msra.mxu1 %v1022_v50 }
  0x78   : > { %655 = vmatprep.subr.bf16.mxu0 %v993_v43  ;;  %696 = vmatprep.subr.bf16.mxu1 %v1023_v52 }
  0x7b   : > { %656 = vmatpush1.bf16.msra.mxu0 %v995_v45  ;;  %697 = vmatpush1.bf16.msra.mxu1 %v1025_v54 }
  0x7c   : > { %657 = vmatprep.subr.bf16.mxu0 %v999_v47  ;;  %698 = vmatprep.subr.bf16.mxu1 %v1026_v56 }
  0x7f   : > { %658 = vmatpush1.bf16.msra.mxu0 %v1001_v49  ;;  %699 = vmatpush1.bf16.msra.mxu1 %v1028_v58 }
  0x80   : > { %659 = vmatprep.subr.bf16.mxu0 %v1005_v51  ;;  %700 = vmatprep.subr.bf16.mxu1 %v1029_v60 }
  0x83   : > { %660 = vmatpush1.bf16.msra.mxu0 %v1007_v53  ;;  %701 = vmatpush1.bf16.msra.mxu1 %v1031_v62 }
  0x84   : > { %661 = vmatprep.subr.bf16.mxu0 %v1011_v55  ;;  %702 = vmatprep.subr.bf16.mxu1 %v1032_v63 }
  0x87   : > { %662 = vmatpush1.bf16.msra.mxu0 %v1013_v57  ;;  %703 = vmatpush1.bf16.msra.mxu1 %v1034_v1 }
  0x88   : > { %663 = vmatprep.subr.bf16.mxu0 %v1017_v59  ;;  %704 = vmatprep.subr.bf16.mxu1 %v1035_v2 }
  0x8b   : > { %664 = vmatpush1.bf16.msra.mxu0 %v1019_v61  ;;  %705 = vmatpush1.bf16.msra.mxu1 %v1037_v3 }
  0x8e   : > { %666 = vmatmul.mubr.bf16.vlgmr.msra.gmra.mrb[0].mxu0 %v225_v0  ;;  %707 = vmatmul.mubr.bf16.vlgmr.msra.gmra.mrb[0].mxu1 %v225_v0 }
 0x161   : > { %v667_v10 = vpop.f32.mrb[0].mxu0  ;;  %v708_v19 = vpop.f32.mrb[0].mxu1 }
 0x162   : > { %v668_v12 = vadd.f32 %v667_v10, %v616_v9  ;;  %v669_v13 = vpop.f32.mrb[1].mxu0  ;;  %v710_v20 = vpop.f32.mrb[1].mxu1  ;;  %v709_v33 = vadd.f32 %v708_v19, %v624_v30 }
 0x163   : > { %v671_v14 = vpop.f32.mrb[2].mxu0  ;;  %v670_v17 = vadd.f32 %v669_v13, %v620_v11  ;;  %v712_v21 = vpop.f32.mrb[2].mxu1  ;;  %v711_v31 = vadd.f32 %v710_v20, %v628_v27 }
 0x164   : > { %v884_v15 = vmul.f32 -1.442695, %v668_v12  ;;  %v672_v16 = vpop.f32.mrb[3].mxu0  ;;  %v713_v22 = vpop.f32.mrb[3].mxu1 }
 0x165   : > { %v885_v18 = vmul.f32 -1.442695, %v670_v17 }
 0x166   : > { %1038 = vpow2.f32 %v884_v15 }
 0x167   : > { %1040 = vpow2.f32 %v885_v18 }
 0x170   : > { %v1039_v23 = vpop.eup %1038 }
 0x171   : > { %v718_v24 = vadd.f32 1.0, %v1039_v23  ;;  %v1041_v28 = vpop.eup %1040 }
 0x172   : > { %v724_v29 = vadd.f32 1.0, %v1041_v28 }
 0x173   : > { %1042 = vrcp.f32 %v718_v24 }
 0x174   : > { %1044 = vrcp.f32 %v724_v29 }
 0x17d   : > { %v1043_v32 = vpop.eup %1042 }
 0x17e   : > { %v727_v34 = vmul.f32 %v1043_v32, %v711_v31  ;;  %v1045_v36 = vpop.eup %1044 }
 0x17f   : > { %v730_v38 = vsub.f32 1.0, %v1045_v36  ;;  %v732_v41 = vmul.f32 %v1045_v36, %v1297_v37 }
 0x180   : > { %v728_v35 = vadd.f32 %v727_v34, %v709_v33 }
 0x182   : > { %1046 = vtanh.f32 %v728_v35 }
 0x18c   : > { %v1047_v39 = vpop.eup %1046 }
 0x18d   : > { %v731_v40 = vmul.f32 %v1047_v39, %v730_v38 }
 0x18f   : > { %v733_v42 = vadd.f32 %v732_v41, %v731_v40 }
 0x191   : > { %734 = vst [vmem:[#allocation2] sm:$0x1] %v733_v42  ;;  %735 = vst [vmem:[%s1290_s13] sm:$0x1] %v733_v42 }
 0x192   : > { %1101 = shalt.err (!%p1098_p13)
}
 0x193   : > { %s1102_s30 = scalar_lea.hbm %s1315_s29, 16  ;;  %s1106_s15 = scalar_lea.hbm %s1365_s5, 128 }
 0x194   : > { %p1103_p3 = scmp.ne.s32.totalorder %s1315_s29, %s1102_s30  ;;  %p1107_p6 = scmp.lt.u32.totalorder %s1315_s29, %s1365_s5 }
 0x195   : > { %p1108_p10 = scmp.lt.u32.totalorder %s1106_s15, %s1102_s30  ;;  %p1110_p0 = scmp.lt.u32.totalorder %s1102_s30, %s1315_s29 }
 0x196   : > { %p1104_p5 = pnand %p1103_p3, %p1377_p1 }
 0x197   : > { %p1109_p11 = por %p1108_p10, %p1107_p6 }
 0x198   : > { %p1105_p7 = pneg %p1104_p5 }
 0x199   : > { %p1111_p2 = por %p1110_p0, %p1109_p11 }
 0x19b   : > { %p1112_p4 = pnand %p1111_p2, %p1105_p7 }
 0x19d   : > { %1115 = shalt.err (!%p1112_p4)
}
 0x19e   : > { %893 = dma.vmem_to_hbm [thread:$0]  (%p1377_p1), %s1317_s21, 16, %s1315_s29, %s737_s10  }
 0x19f PF: > { %p905_p8 = scmp.ge.s32.totalorder %s1156_s25, 2  ;;  %s761_s18 = sand.u32 1, %s1144_s23  }
 0x1a0   : > { %p1378_p9 = scmp.ne.s32.totalorder %s1370_s8, 0  ;;  %s762_s19 = scalar_lea.sflag [#allocation7], %s761_s18 }
 0x1a2   : > { %p900_p12 = pnand %p905_p8, %p1378_p9 }
 0x1a4   : > { %1139 = dma.done.wait (!%p900_p12), %s762_s19, 16  }
 0x1a5   : > { %1141 = vsyncadd (!%p900_p12), %s762_s19, 4294967280  ;;  %p22_p13 = scmp.ge.s32.totalorder %s1221_s28, 10   ;;  %s1379_s23 = smov %s1148_s24 }
 0x1a6   : > { %s1380_s24 = smov %s1152_s0  ;;  %s1381_s0 = smov %s1232_s6 }
 0x1a7   : > { %s1382_s25 = smov %s1221_s28  ;;  %24 = sbr.rel (!%p22_p13) target bundleno = 19 (0x13), region = 80 }
 0x1ae   :  { %766 = vsyncpa [#allocation6], 1 }
 0x1af   :  { %768 = vsyncpa [#allocation6 + $0x1], 1 }
 0x1b0   :  { %769 = vsyncpa [#allocation7], 1 }
 0x1b1   :  { %771 = vsyncpa [#allocation7 + $0x1], 1 }

</bundles_post_ra>
